<compile_context>
chip_gen: v5e
topology: v5e:2x2
jax: 0.10.0
libtpu: 0.0.40
codegen_flags: <defaults>
</compile_context>

<pallas_src>
import functools

import jax
import jax.numpy as jnp
from jax.experimental import pallas as pl
from jax.experimental.pallas import tpu as pltpu


def _cdiv(a: int, b: int) -> int:
    return -(-a // b)


def _round_up(x: int, m: int) -> int:
    return _cdiv(x, m) * m


def _vmem_capacity_bytes() -> int:
    try:
        cap = getattr(pltpu.get_tpu_info(), "vmem_capacity_bytes", None)
        if cap:
            return int(cap)
    except Exception:
        pass
    return 128 * 1024 * 1024  # v5e / v6e default


def _ls_ce_kernel(*refs, n_valid: int, tile_n: int, use_mxu_rowsum: bool):
    if use_mxu_rowsum:
        logits_ref, tgt_ref, ones_ref, out_ref = refs
    else:
        logits_ref, tgt_ref, out_ref = refs

    x = logits_ref[...]                                   # (tile_n, C) native dtype
    c = x.shape[-1]

    # Row max in the native dtype (exact); per-row f32 upcast only.
    m = jnp.max(x, axis=-1, keepdims=True).astype(jnp.float32)       # (tile_n, 1)

    # Only full-tile f32 upcast happens here, feeding exp (EUP slot).
    shifted = x.astype(jnp.float32) - m                              # (tile_n, C) f32
    sumexp = jnp.sum(jnp.exp(shifted), axis=-1, keepdims=True)       # (tile_n, 1)
    lse = m + jnp.log(sumexp)                                        # full logsumexp L_i

    # Row sum of the raw logits: sum_j x_ij (for the smoothing term).
    if use_mxu_rowsum:
        # MXU: (tile_n, C) @ (C, 128) ones with f32 accumulation (exact for
        # bf16 inputs); frees VALU slots — this kernel is VPU-bound on v6e/v7x.
        sum_x = jnp.dot(x, ones_ref[...],
                        preferred_element_type=jnp.float32)[:, :1]   # (tile_n, 1)
    else:
        sum_x = jnp.sum(x, axis=-1, keepdims=True)                   # x already f32

    # Target logit x[i, t_i] via compare/select in the native dtype
    # (one nonzero per row -> exact even when summed in bf16).
    col_ids = jax.lax.broadcasted_iota(jnp.int32, x.shape, 1)
    x_tgt = jnp.sum(jnp.where(col_ids == tgt_ref[...], x, 0.0),
                    axis=-1, keepdims=True).astype(jnp.float32)      # (tile_n, 1)

    #   -sum_j logp_ij = C * L_i - sum_j x_ij
    #   -logp[i, t_i]  = L_i - x[i, t_i]
    smooth = c * lse - sum_x
    nll = lse - x_tgt

    # Ragged tail: rows >= n_valid hold undefined data (logits are NOT padded
    # in HBM).  Use where (not multiply) so inf/NaN garbage can't become NaN*0.
    row_ids = pl.program_id(0) * tile_n + jax.lax.broadcasted_iota(
        jnp.int32, (tile_n, 1), 0)
    valid = row_ids < n_valid
    smooth_sum = jnp.sum(jnp.where(valid, smooth, 0.0))
    nll_sum = jnp.sum(jnp.where(valid, nll, 0.0))

    # Lane-dense per-tile partial output: lane 0 = smoothing partial, lane 1 = NLL.
    lane = jax.lax.broadcasted_iota(jnp.int32, out_ref.shape, 2)
    out_ref[...] = jnp.where(lane == 0, smooth_sum,
                             jnp.where(lane == 1, nll_sum, 0.0))


def label_smoothing_cross_entropy(logits, target, eps: float = 0.1,
                                  reduction: str = "mean",
                                  max_tile_n: int = 2048):
    """logits: (N, C) float (any dtype), target: (N,) int. Returns f32 scalar."""
    n, c = logits.shape
    in_item = jnp.dtype(logits.dtype).itemsize
    use_mxu_rowsum = logits.dtype == jnp.bfloat16  # exact f32 acc on MXU; f32 stays on VPU

    # ---- generation- and C-aware tile sizing -------------------------------
    cap = _vmem_capacity_bytes()          # 64 MiB/TC (v7x) or 128 MiB (v5e/v6e)
    vmem_limit = int(cap * 0.8)
    tile_budget = int(cap * 0.6)

    sub = 16 if logits.dtype == jnp.bfloat16 else 8   # sublane packing
    # Per-row VMEM footprint: double-buffered streamed tile + live f32
    # temporaries (shifted, exp(shifted)) + native select temp + slack.
    per_row = c * (2 * in_item + 4 + 4 + in_item + 4)
    ones_bytes = 2 * c * 128 * in_item if use_mxu_rowsum else 0

    tile_n = max(tile_budget - ones_bytes, per_row * sub) // per_row
    tile_n = max(sub, (tile_n // sub) * sub)
    tile_n = min(tile_n, max_tile_n)
    tile_n = min(tile_n, _round_up(n, sub))
    # Aim for >= 4 row tiles so both v7x TensorCores get work and the
    # double-buffered pipeline has depth (per-step overhead ~0.35 us is cheap).
    tile_n = min(tile_n, max(sub, _round_up(_cdiv(n, 4), sub)))
    num_tiles = _cdiv(n, tile_n)

    tgt2d = target.astype(jnp.int32).reshape(n, 1)

    in_specs = [
        pl.BlockSpec((tile_n, c), lambda i: (i, 0)),   # logits tile (native dtype)
        pl.BlockSpec((tile_n, 1), lambda i: (i, 0)),   # targets tile
    ]
    args = [logits, tgt2d]
    if use_mxu_rowsum:
        ones = jnp.ones((c, 128), dtype=logits.dtype)
        in_specs.append(pl.BlockSpec((c, 128), lambda i: (0, 0)))  # resident; fetched once
        args.append(ones)

    flops = 8 * n * c + (2 * n * c * 128 if use_mxu_rowsum else 0)
    bytes_accessed = (n * c * in_item + n * 4 + num_tiles * 8 * 128 * 4
                      + (ones_bytes // 2))

    parts = pl.pallas_call(
        functools.partial(_ls_ce_kernel, n_valid=n, tile_n=tile_n,
                          use_mxu_rowsum=use_mxu_rowsum),
        out_shape=jax.ShapeDtypeStruct((num_tiles, 8, 128), jnp.float32),
        grid_spec=pltpu.PrefetchScalarGridSpec(
            num_scalar_prefetch=0,
            grid=(num_tiles,),
            in_specs=in_specs,
            out_specs=pl.BlockSpec((1, 8, 128), lambda i: (i, 0, 0)),
        ),
        compiler_params=pltpu.CompilerParams(
            dimension_semantics=("parallel",),     # row axis shards across TCs (v7x)
            vmem_limit_bytes=vmem_limit,
        ),
        cost_estimate=pl.CostEstimate(
            flops=flops, transcendentals=n * c, bytes_accessed=bytes_accessed),
    )(*args)

    smooth_total = jnp.sum(parts[:, 0, 0])
    nll_total = jnp.sum(parts[:, 0, 1])

    if reduction == "mean":
        scale = 1.0 / n
    elif reduction == "sum":
        scale = 1.0
    else:
        # TODO(synk): reduction='none' needs per-row outputs, not partial sums.
        raise NotImplementedError(f"reduction={reduction!r} not supported")

    return (smooth_total * scale) * (eps / c) + (1.0 - eps) * (nll_total * scale)


def _reference(logits, target, eps=0.1):
    # Pure-JAX reference mirroring the PyTorch module (reduction='mean').
    c = logits.shape[-1]
    logp = jax.nn.log_softmax(logits.astype(jnp.float32), axis=-1)
    loss = jnp.mean(-jnp.sum(logp, axis=-1))
    nll = jnp.mean(-jnp.take_along_axis(logp, target[:, None], axis=-1)[:, 0])
    return loss * eps / c + (1.0 - eps) * nll


if __name__ == "__main__":
    key = jax.random.PRNGKey(0)
    k1, k2 = jax.random.split(key)
    # N deliberately NOT a tile multiple -> exercises the ragged-tail path
    # (no host-side padding of the logits).
    N, C = 20, 32
    logits = jax.random.normal(k1, (N, C), dtype=jnp.float32)
    target = jax.random.randint(k2, (N,), 0, C, dtype=jnp.int32)

    # f32 path (VPU row-sum)
    out = label_smoothing_cross_entropy(logits, target, eps=0.1)
    out = jax.block_until_ready(out)
    ref = _reference(logits, target, eps=0.1)
    assert jnp.allclose(out, ref, atol=1e-5, rtol=1e-5), (out, ref)

    # native-bf16 path (no host upcast; MXU row-sum; ragged last tile)
    logits_bf16 = logits.astype(jnp.bfloat16)
    out_bf = label_smoothing_cross_entropy(logits_bf16, target, eps=0.1)
    out_bf = jax.block_until_ready(out_bf)
    ref_bf = _reference(logits_bf16, target, eps=0.1)
    assert jnp.allclose(out_bf, ref_bf, atol=1e-4, rtol=1e-4), (out_bf, ref_bf)

    print("KERNEL_OK")
</pallas_src>

<mosaic_0001>
module attributes {stable_mosaic.version = 11 : i64} {
  func.func @_ls_ce_kernel(%arg0: i32, %arg1: memref<8x32xf32, #tpu.memory_space<vmem>>, %arg2: memref<8x1xi32, #tpu.memory_space<vmem>>, %arg3: memref<1x8x128xf32, #tpu.memory_space<vmem>>) attributes {dimension_semantics = [#tpu.dimension_semantics<parallel>], iteration_bounds = array<i64: 3>, scalar_prefetch = 0 : i64, scratch_operands = 0 : i64, tpu.core_type = #tpu.core_type<tc>, window_params = [{transform_indices = @transform_0, window_bounds = array<i64: 8, 32>}, {transform_indices = @transform_1, window_bounds = array<i64: 8, 1>}, {transform_indices = @transform_2, window_bounds = array<i64: 1, 8, 128>}]} {
    %c0 = arith.constant 0 : index
    %c0_0 = arith.constant 0 : index
    %0 = vector.load %arg1[%c0, %c0_0] : memref<8x32xf32, #tpu.memory_space<vmem>>, vector<8x32xf32>
    %cst = arith.constant dense<0xFF800000> : vector<8xf32>
    %1 = vector.multi_reduction <maximumf>, %0, %cst [1] : vector<8x32xf32> to vector<8xf32>
    %2 = vector.shape_cast %1 : vector<8xf32> to vector<8x1xf32>
    %3 = vector.broadcast %2 : vector<8x1xf32> to vector<8x32xf32>
    %4 = arith.subf %0, %3 : vector<8x32xf32>
    %5 = math.exp %4 : vector<8x32xf32>
    %cst_1 = arith.constant dense<0.000000e+00> : vector<8xf32>
    %6 = vector.multi_reduction <add>, %5, %cst_1 [1] : vector<8x32xf32> to vector<8xf32>
    %7 = vector.shape_cast %6 : vector<8xf32> to vector<8x1xf32>
    %8 = math.log %7 : vector<8x1xf32>
    %9 = arith.addf %2, %8 : vector<8x1xf32>
    %cst_2 = arith.constant dense<0.000000e+00> : vector<8xf32>
    %10 = vector.multi_reduction <add>, %0, %cst_2 [1] : vector<8x32xf32> to vector<8xf32>
    %11 = vector.shape_cast %10 : vector<8xf32> to vector<8x1xf32>
    %12 = tpu.iota {dimensions = array<i32: 1>} : vector<8x32xi32>
    %c0_3 = arith.constant 0 : index
    %c0_4 = arith.constant 0 : index
    %13 = vector.load %arg2[%c0_3, %c0_4] : memref<8x1xi32, #tpu.memory_space<vmem>>, vector<8x1xi32>
    %14 = vector.broadcast %13 : vector<8x1xi32> to vector<8x32xi32>
    %15 = arith.cmpi eq, %12, %14 : vector<8x32xi32>
    %cst_5 = arith.constant 0.000000e+00 : f32
    %16 = vector.broadcast %cst_5 : f32 to vector<8x32xf32>
    %17 = arith.select %15, %0, %16 : vector<8x32xi1>, vector<8x32xf32>
    %cst_6 = arith.constant dense<0.000000e+00> : vector<8xf32>
    %18 = vector.multi_reduction <add>, %17, %cst_6 [1] : vector<8x32xf32> to vector<8xf32>
    %19 = vector.shape_cast %18 : vector<8xf32> to vector<8x1xf32>
    %cst_7 = arith.constant 3.200000e+01 : f32
    %20 = vector.broadcast %cst_7 : f32 to vector<8x1xf32>
    %21 = arith.mulf %20, %9 : vector<8x1xf32>
    %22 = arith.subf %21, %11 : vector<8x1xf32>
    %23 = arith.subf %9, %19 : vector<8x1xf32>
    %c8_i32 = arith.constant 8 : i32
    %24 = arith.muli %arg0, %c8_i32 : i32
    %25 = tpu.iota {dimensions = array<i32: 0>} : vector<8x1xi32>
    %26 = vector.broadcast %24 : i32 to vector<8x1xi32>
    %27 = arith.addi %26, %25 : vector<8x1xi32>
    %c20_i32 = arith.constant 20 : i32
    %28 = vector.broadcast %c20_i32 : i32 to vector<8x1xi32>
    %29 = arith.cmpi slt, %27, %28 : vector<8x1xi32>
    %cst_8 = arith.constant 0.000000e+00 : f32
    %30 = vector.broadcast %cst_8 : f32 to vector<8x1xf32>
    %31 = arith.select %29, %22, %30 : vector<8x1xi1>, vector<8x1xf32>
    %32 = vector.shape_cast %31 : vector<8x1xf32> to vector<1x8x1xf32>
    %cst_9 = arith.constant dense<0.000000e+00> : vector<1xf32>
    %33 = vector.multi_reduction <add>, %32, %cst_9 [1, 2] : vector<1x8x1xf32> to vector<1xf32>
    %34 = vector.shape_cast %33 : vector<1xf32> to vector<1x1x1xf32>
    %35 = vector.extract %34[0, 0, 0] : f32 from vector<1x1x1xf32>
    %cst_10 = arith.constant 0.000000e+00 : f32
    %36 = vector.broadcast %cst_10 : f32 to vector<8x1xf32>
    %37 = arith.select %29, %23, %36 : vector<8x1xi1>, vector<8x1xf32>
    %38 = vector.shape_cast %37 : vector<8x1xf32> to vector<1x8x1xf32>
    %cst_11 = arith.constant dense<0.000000e+00> : vector<1xf32>
    %39 = vector.multi_reduction <add>, %38, %cst_11 [1, 2] : vector<1x8x1xf32> to vector<1xf32>
    %40 = vector.shape_cast %39 : vector<1xf32> to vector<1x1x1xf32>
    %41 = vector.extract %40[0, 0, 0] : f32 from vector<1x1x1xf32>
    %42 = tpu.iota {dimensions = array<i32: 2>} : vector<1x8x128xi32>
    %c0_i32 = arith.constant 0 : i32
    %43 = vector.broadcast %c0_i32 : i32 to vector<1x8x128xi32>
    %44 = arith.cmpi eq, %42, %43 : vector<1x8x128xi32>
    %c1_i32 = arith.constant 1 : i32
    %45 = vector.broadcast %c1_i32 : i32 to vector<1x8x128xi32>
    %46 = arith.cmpi eq, %42, %45 : vector<1x8x128xi32>
    %cst_12 = arith.constant 0.000000e+00 : f32
    %47 = vector.broadcast %41 : f32 to vector<1x8x128xf32>
    %48 = vector.broadcast %cst_12 : f32 to vector<1x8x128xf32>
    %49 = arith.select %46, %47, %48 : vector<1x8x128xi1>, vector<1x8x128xf32>
    %50 = vector.broadcast %35 : f32 to vector<1x8x128xf32>
    %51 = arith.select %44, %50, %49 : vector<1x8x128xi1>, vector<1x8x128xf32>
    %c0_13 = arith.constant 0 : index
    %c0_14 = arith.constant 0 : index
    %c0_15 = arith.constant 0 : index
    %52 = vector.load %arg3[%c0_13, %c0_14, %c0_15] : memref<1x8x128xf32, #tpu.memory_space<vmem>>, vector<1x8x128xf32>
    tpu.vector_store %arg3[%c0_13, %c0_14, %c0_15], %51 {strides = array<i32>} : memref<1x8x128xf32, #tpu.memory_space<vmem>>, vector<1x8x128xf32>,
    return
  }
  func.func @transform_0(%arg0: i32) -> (i32, i32) {
    %c0_i32 = arith.constant 0 : i32
    %c0_i32_0 = arith.constant 0 : i32
    return %arg0, %c0_i32 : i32, i32
  }
  func.func @transform_1(%arg0: i32) -> (i32, i32) {
    %c0_i32 = arith.constant 0 : i32
    %c0_i32_0 = arith.constant 0 : i32
    return %arg0, %c0_i32 : i32, i32
  }
  func.func @transform_2(%arg0: i32) -> (i32, i32, i32) {
    %c0_i32 = arith.constant 0 : i32
    %c0_i32_0 = arith.constant 0 : i32
    %c0_i32_1 = arith.constant 0 : i32
    return %arg0, %c0_i32, %c0_i32_0 : i32, i32, i32
  }
}

</mosaic_0001>

<bundles_post_ra>
// kernel: tpu_custom_call.1
= control target key start
LH: loop header
LB: loop body
LE: loop exit
PB: predicated region body
PF: predicated region fallthrough
CT: control target
= control target key end

     0   :  { %7 = vsyncpa [#allocation3], 0  ;;  %s552_s0 = inlined_call_operand.vmem [shape: f32[20,32], index: 0, kind: input, shape index: {}]   ;;  %s553_s1 = inlined_call_operand.vmem [shape: s32[20,1], index: 1, kind: input, shape index: {}]   ;;  %s554_s2 = inlined_call_operand.hbm [shape: f32[3,8,128], index: 2, kind: output, shape index: {}]  }
   0x1   :  { %9 = vsyncpa [#allocation3 + $0x1], 0  ;;  %s451_s9 = smov 0   ;;  %s453_s10 = smov 0  }
   0x2   :  { %s455_s11 = smov 0   ;;  %s457_s12 = smov 0  }
   0x3 LB: > { %s472_s13 = sadd.s32 4294967295, %s433_s12   ;;  %s310_s14 = sadd.s32 4294967294, %s433_s12   ;;  %s433_s12 = sphi %s457_s12, %s560_s12   ;;  %s429_s11 = sphi %s455_s11, %s559_s11   ;;  %s425_s10 = sphi %s453_s10, %s558_s10   ;;  %s421_s9 = sphi %s451_s9, %s557_s9  }
   0x4   : > { %s476_s15 = sadd.s32 1, %s433_s12   ;;  %s74_s16 = sadd.s32 1, %s429_s11 }
   0x5   : > { %s71_s17 = ssub.s32 %s433_s12, %s476_s15  ;;  %p84_p0 = scmp.ne.s32.totalorder %s429_s11, %s425_s10 }
   0x6   : > { %p72_p1 = scmp.eq.s32.totalorder %s71_s17, 0  ;;  %p85_p2 = scmp.eq.s32.totalorder %s472_s13, 2 }
   0x7   : > { %p90_p3 = scmp.ne.s32.totalorder %s425_s10, %s421_s9  ;;  %p91_p4 = scmp.eq.s32.totalorder %s310_s14, 2 }
   0x8   : > { %s487_s18 = scalar_select %p72_p1, %s429_s11, %s74_s16  }
   0x9   : > { %p489_p5 = por %p85_p2, %p84_p0  ;;  %p493_p6 = por %p91_p4, %p90_p3 }
   0xa   : > { %p313_p7 = scmp.ge.s32.totalorder %s433_s12, 1  ;;  %p123_p8 = scmp.lt.s32.totalorder %s433_s12, 4 }
   0xc   : > { %p124_p9 = pnand %p313_p7, %p123_p8 }
   0xd   : > { %p148_p10 = scmp.lt.s32.totalorder (!%p124_p9), %s472_s13, 2  ;;  %s317_s29 = sshll.u32 (!%p124_p9), %s472_s13, 3 }
   0xe   : > { %127 = sbr.rel (%p124_p9) target bundleno = 471 (0x1d7), region = 28  ;;  %s145_s30 = sand.u32 (!%p124_p9), 1, %s425_s10  }
   0xf   : > { %s314_s3 = sshll.u32 (!%p124_p9), %s145_s30, 3  ;;  %s234_s6 = scalar_lea.hbm (!%p124_p9), %s554_s2, %s317_s29 }
  0x10   : > { %s147_s7 = scalar_lea.vmem (!%p124_p9), [#allocation2], %s314_s3  ;;  %s238_s16 = sshll.u32 (!%p124_p9), %s234_s6, 4  ;;  %s239_s16 = int_to_ptr.hbm [resolvable:$true] %s238_s16 }
  0x11   : > { %s236_s8 = sshll.u32 (!%p124_p9), %s147_s7, 4  ;;  %s237_s8 = int_to_ptr.vmem [resolvable:$true] %s236_s8 }
  0x13   : > { %v435_v0 = vmov 0   ;;  %s149_s21 = scalar_select %p148_p10, %s472_s13, 2  ;;  %vm157_vm0 = vcmask 261120   ;;  %v173_v9 = vlaneseq  ;;  %v190_v17 = vstv %s317_s29 }
  0x14   : > { %366 = vset.pattern.permute.xlu0 %v435_v0  ;;  %vm194_vm3 = vcmask 7168   ;;  %s224_s13 = scalar_lea.sflag [#allocation3], %s145_s30 }
  0x15   : > { %s315_s22 = sshll.u32 %s149_s21, 3  ;;  %v509_v10 = vand.u32 127, %v173_v9  ;;  %v189_v16 = vshrl.u32 %v173_v9, 7  ;;  %s385_s21 = sshra.s32 %s239_s16, 4  ;;  %s386_s21 = int_to_ptr.hbm [resolvable:$true] %s385_s21 }
  0x16   : > { %s151_s25 = scalar_lea.vmem %s552_s0, %s315_s22  ;;  %s155_s28 = scalar_lea.vmem %s553_s1, %s315_s22 }
  0x17   : > { %v156_v1 = vld [vmem:[%s151_s25] sm:$0xff]  ;;  %v191_v19 = vadd.s32 %v190_v17, %v189_v16  ;;  %vm217_vm4 = vcmp.eq.s32.totalorder %v509_v10, 1  ;;  %vm216_vm5 = vcmp.eq.s32.totalorder %v509_v10, 0  ;;  %s387_s22 = scalar_lea.hbm %s386_s21, 8  ;;  %s391_s25 = scalar_lea.hbm %s554_s2, 24 }
  0x18   : > { %v158_v2 = vsel %vm157_vm0, %v156_v1, -inf  ;;  %v175_v3 = vld [vmem:[%s155_s28] sm:$0xff]  ;;  %v170_v11 = vsel %vm157_vm0, %v156_v1, 0.0  ;;  %p388_p11 = scmp.ne.s32.totalorder %s386_s21, %s387_s22  ;;  %p392_p0 = scmp.lt.s32.totalorder %s386_s21, %s554_s2 }
  0x19   : > { %159 = vmax.xlane.f32.xlu0 %v158_v2  ;;  %vm192_vm2 = vcmp.lt.s32.totalorder %v191_v19, 20  ;;  %p393_p1 = scmp.lt.s32.totalorder %s391_s25, %s387_s22 }
  0x1a   : > { %p389_p12 = pnand %p388_p11, %p489_p5 }
  0x1b   : > { %p394_p2 = por %p393_p1, %p392_p0 }
  0x1c   : > { %p390_p13 = pneg %p389_p12 }
  0x1e   : > { %p395_p3 = pnand %p394_p2, %p390_p13 }
  0x2d   : > { %177 = vperm.xlu0 %366, %v175_v3  }
  0x8c   : > { %v160_v4 = vpop.xlane.xlu0 %159 }
  0x8d   : > { %v161_v5 = vsub.f32 %v156_v1, %v160_v4 }
  0x8f   : > { %v162_v6 = vmul.f32 1.442695, %v161_v5 }
  0x91   : > { %367 = vpow2.f32 %v162_v6 }
  0x97   : > { %v368_v7 = vpop.eup %367 }
  0x98   : > { %v164_v8 = vsel %vm157_vm0, %v368_v7, 0.0 }
  0x99   : > { %165 = vadd.xlane.f32.xlu1 %v164_v8 }
  0x9f   : > { %v178_v12 = vpop.permute.xlu0 %177 }
  0xa0   : > { %vm179_vm1 = vcmp.eq.s32.totalorder %v509_v10, %v178_v12 }
  0xa1   : > { %v180_v13 = vsel %vm179_vm1, %v156_v1, 0.0  ;;  %171 = vadd.xlane.f32.xlu1 %v170_v11 }
  0xa2   : > { %v181_v14 = vsel %vm157_vm0, %v180_v13, 0.0 }
  0xa3   : > { %182 = vadd.xlane.f32.xlu2 %v181_v14 }
 0x10c   : > { %v166_v15 = vpop.xlane.xlu1 %165 }
 0x10d   : > { %369 = vlog2.f32 %v166_v15 }
 0x113   : > { %v370_v18 = vpop.eup %369 }
 0x114   : > { %v168_v20 = vmul.f32 0.6931472, %v370_v18  ;;  %v172_v23 = vpop.xlane.xlu1 %171 }
 0x116   : > { %v169_v21 = vadd.f32 %v168_v20, %v160_v4  ;;  %v183_v22 = vpop.xlane.xlu2 %182 }
 0x118   : > { %v186_v24 = vsub.f32 %v169_v21, %v183_v22  ;;  %v184_v25 = vmul.f32 32.0, %v169_v21 }
 0x11a   : > { %v185_v26 = vsub.f32 %v184_v25, %v172_v23  ;;  %v205_v27 = vsel %vm192_vm2, %v186_v24, 0.0 }
 0x11b   : > { %v206_v28 = vsel %vm194_vm3, %v205_v27, 0.0 }
 0x11c   : > { %207 = vadd.xlane.f32.xlu1 %v206_v28  ;;  %v193_v29 = vsel %vm192_vm2, %v185_v26, 0.0 }
 0x11d   : > { %v195_v30 = vsel %vm194_vm3, %v193_v29, 0.0 }
 0x11e   : > { %196 = vadd.xlane.f32.xlu2 %v195_v30 }
 0x18f   : > { %v208_v31 = vpop.xlane.xlu1 %207 }
 0x190   : > { %v209_v32 = vrot.slane %v208_v31, 4 }
 0x191   : > { %v197_v33 = vpop.xlane.xlu2 %196 }
 0x192   : > { %v210_v34 = vadd.f32 %v209_v32, %v208_v31  ;;  %v198_v35 = vrot.slane %v197_v33, 4 }
 0x194   : > { %v211_v36 = vrot.slane %v210_v34, 2  ;;  %v199_v37 = vadd.f32 %v198_v35, %v197_v33 }
 0x196   : > { %v212_v38 = vadd.f32 %v211_v36, %v210_v34  ;;  %v200_v39 = vrot.slane %v199_v37, 2 }
 0x198   : > { %v201_v40 = vadd.f32 %v200_v39, %v199_v37  ;;  %v213_v41 = vrot.slane %v212_v38, 1 }
 0x19a   : > { %v202_v42 = vrot.slane %v201_v40, 1  ;;  %v214_v44 = vadd.f32 %v213_v41, %v212_v38 }
 0x19c   : > { %v203_v43 = vadd.f32 %v202_v42, %v201_v40 }
 0x19e   : > { %322 = vpush %v203_v43 }
 0x19f   : > { %324 = vpush %v214_v44 }
 0x1cf   : > { %s323_s14 = spop %322 }
 0x1d0   : > { %v220_v45 = vstv %s323_s14  ;;  %s325_s17 = spop %324 }
 0x1d1   : > { %v218_v46 = vstv %s325_s17 }
 0x1d2   : > { %v219_v47 = vsel %vm217_vm4, %v218_v46, 0.0 }
 0x1d3   : > { %v221_v48 = vsel %vm216_vm5, %v220_v45, %v219_v47 }
 0x1d4   : > { %222 = vst [vmem:[%s147_s7] sm:$0xff] %v221_v48 }
 0x1d5   : > { %398 = shalt.err (!%p395_p3)
}
 0x1d6   : > { %326 = dma.vmem_to_hbm [thread:$0]  (%p489_p5), %s237_s8, 128, %s239_s16, %s224_s13  }
 0x1d7 PF: > { %p332_p4 = scmp.ge.s32.totalorder %s433_s12, 2  ;;  %s250_s28 = sand.u32 1, %s421_s9  }
 0x1d8   : > { %s251_s29 = scalar_lea.sflag [#allocation3], %s250_s28 }
 0x1d9   : > { %p329_p7 = pnand %p332_p4, %p493_p6 }
 0x1db   : > { %p330_p8 = pneg %p329_p7 }
 0x1dd   : > { %416 = dma.done.wait (%p330_p8), %s251_s29, 128  }
 0x1de   : > { %418 = vsyncadd (%p330_p8), %s251_s29, 4294967168  ;;  %p12_p9 = scmp.ge.s32.totalorder %s476_s15, 5   ;;  %s557_s9 = smov %s425_s10 }
 0x1df   : > { %s558_s10 = smov %s429_s11  ;;  %s559_s11 = smov %s487_s18 }
 0x1e0   : > { %s560_s12 = smov %s476_s15  ;;  %14 = sbr.rel (!%p12_p9) target bundleno = 3 (0x3), region = 66 }
 0x1e5   :  { %257 = vsyncpa [#allocation3], 1 }
 0x1e6   :  { %259 = vsyncpa [#allocation3 + $0x1], 1 }

</bundles_post_ra>
